<compile_context>
chip_gen: v7x
topology: tpu7x:2x2x1
jax: 0.10.0
libtpu: 0.0.40
codegen_flags: <defaults>
</compile_context>

<pallas_src>
import math

import jax
import jax.numpy as jnp
from jax.experimental import pallas as pl
from jax.experimental.pallas import tpu as pltpu


def _round_up(x, m):
    return ((x + m - 1) // m) * m


# ---------------------------------------------------------------------------
# Kernel
# ---------------------------------------------------------------------------
def _head_kernel(x_ref, w1_ref, b1_ref, w2_ref, b2_ref, o_ref):
    """One batch tile of y = relu(x @ W1 + b1) @ W2 + b2.

    Weights arrive pre-transposed to [in, out] layout, so both contractions
    are plain row-major matmuls (lhs dim 1 vs rhs dim 0) -- no in-loop
    transposes of the resident weights.

    Per-grid-step shapes:
      x:  [TM, H]    w1: [H, H]    b1: [1, H]
      w2: [H, Cp]    b2: [1, Cp]   o:  [TM, Cp]   (Cp = n_classes padded to 128)
    """
    w_dt = w1_ref.dtype                                   # static at trace time
    x = x_ref[...]
    lhs1 = x if x.dtype == w_dt else x.astype(w_dt)
    h = jnp.dot(lhs1, w1_ref[...], preferred_element_type=jnp.float32)
    h = jnp.maximum(h + b1_ref[...], 0.0)                 # bias + ReLU in f32 (VPU)
    lhs2 = h if h.dtype == w_dt else h.astype(w_dt)       # bf16 path quantizes h too
    y = jnp.dot(lhs2, w2_ref[...], preferred_element_type=jnp.float32)
    o_ref[...] = (y + b2_ref[...]).astype(o_ref.dtype)


# ---------------------------------------------------------------------------
# Buffered(1) capability probe (single-buffer the constant weight blocks)
# ---------------------------------------------------------------------------
_BUFFERED_ONE_SUPPORTED = None


def _buffered_one_supported():
    """Probe once whether pipeline_mode=pl.Buffered(1) is accepted by this
    JAX/Mosaic build.  Single-buffering constant-index weight blocks halves
    their resident VMEM (they are DMA'd once but would otherwise be
    double-buffer allocated).  Falls back to default buffering if missing."""
    global _BUFFERED_ONE_SUPPORTED
    if _BUFFERED_ONE_SUPPORTED is None:
        try:
            def _probe(x_ref, o_ref):
                o_ref[...] = x_ref[...]

            out = pl.pallas_call(
                _probe,
                out_shape=jax.ShapeDtypeStruct((8, 128), jnp.float32),
                grid=(2,),
                in_specs=[pl.BlockSpec((8, 128), lambda i: (0, 0),
                                       pipeline_mode=pl.Buffered(1))],
                out_specs=pl.BlockSpec((8, 128), lambda i: (0, 0)),
            )(jnp.zeros((8, 128), jnp.float32))
            jax.block_until_ready(out)
            _BUFFERED_ONE_SUPPORTED = True
        except Exception:  # older JAX: no Buffered / no pipeline_mode kwarg
            _BUFFERED_ONE_SUPPORTED = False
    return _BUFFERED_ONE_SUPPORTED


def _resident_spec(block_shape, single_buffer):
    """Constant-index BlockSpec: block stays resident in VMEM across tiles."""
    ndim = len(block_shape)
    index_map = lambda i: (0,) * ndim
    if single_buffer:
        return pl.BlockSpec(block_shape, index_map, pipeline_mode=pl.Buffered(1))
    return pl.BlockSpec(block_shape, index_map)


# ---------------------------------------------------------------------------
# One-time parameter preparation (hoist out of the per-call path)
# ---------------------------------------------------------------------------
def prepare_head_params(w1, b1, w2, b2, *, weights_dtype=jnp.bfloat16):
    """Prepare parameters once at load time (transpose / pad / cast are full
    HBM copies that must not be re-materialized every forward call).

      w1: [H, H]  (dense.weight,    PyTorch [out, in])   b1: [H]
      w2: [C, H]  (out_proj.weight, PyTorch [out, in])   b2: [C]
      weights_dtype: MXU operand dtype (default bf16 -- MXU-native on
        v5e/v6e/v7x, halves weight HBM/VMEM; accumulation stays f32).
        Pass jnp.float32 for full-precision weights.
    """
    w1 = jnp.asarray(w1); b1 = jnp.asarray(b1)
    w2 = jnp.asarray(w2); b2 = jnp.asarray(b2)
    H = w1.shape[0]
    C = w2.shape[0]
    Cp = _round_up(C, 128)                                 # lane-dense output slab
    w_dt = jnp.dtype(weights_dtype) if weights_dtype is not None else w1.dtype

    w1t = w1.T.astype(w_dt)                                # [H, H]  (in, out)
    w2t = jnp.zeros((H, Cp), w_dt).at[:, :C].set(w2.T.astype(w_dt))  # [H, Cp]
    b1r = b1.reshape(1, H).astype(jnp.float32)
    b2r = jnp.zeros((1, Cp), jnp.float32).at[0, :C].set(b2.astype(jnp.float32))
    return {"w1t": w1t, "b1": b1r, "w2t": w2t, "b2": b2r, "n_classes": C}


# ---------------------------------------------------------------------------
# Forward pass
# ---------------------------------------------------------------------------
def apply_head(features, params, *, block_m=512, force_pallas=False,
               vmem_limit_bytes=None):
    """features: [B, H], f32 or bf16 (bf16 activations are used as-is, no
    wrapper-side upcast).  Returns [B, n_classes] in features.dtype."""
    w1t, b1 = params["w1t"], params["b1"]
    w2t, b2 = params["w2t"], params["b2"]
    C = params["n_classes"]
    B, H = features.shape
    Cp = w2t.shape[1]
    out_dtype = features.dtype
    w_dt = w1t.dtype

    # Tiny-shape fast path: a standalone kernel launch + padding copies are
    # pure fixed overhead below this size; plain XLA is faster.
    if not force_pallas and B * H < 16384:
        x = features if features.dtype == w_dt else features.astype(w_dt)
        h = jnp.maximum(
            jnp.dot(x, w1t, preferred_element_type=jnp.float32) + b1, 0.0)
        h = h if h.dtype == w_dt else h.astype(w_dt)
        y = jnp.dot(h, w2t, preferred_element_type=jnp.float32) + b2
        return y[:, :C].astype(out_dtype)

    # Batch tiling: TM rows/step (multiple of 8).  Prefer TM such that Bp == B
    # (no re-pad copy); cap TM so the grid has >= 2 steps when the batch
    # allows, so the "parallel" axis can shard across both v7x TensorCores
    # (harmless on single-TC v5e/v6e).
    TM = min(block_m, _round_up(B, 8))
    if B >= 16:
        TM = min(TM, _round_up(pl.cdiv(B, 2), 8))
    Bp = _round_up(B, TM)
    x = features
    if Bp != B:
        x = jnp.zeros((Bp, H), features.dtype).at[:B, :].set(features)
    grid = (Bp // TM,)

    single_buf = _buffered_one_supported()

    # VMEM budget: double-buffered x tiles + resident weights (x1 if
    # single-buffered, else x2) + output tiles + f32 temporaries headroom.
    weight_bytes = (w1t.size * w1t.dtype.itemsize + w2t.size * w2t.dtype.itemsize
                    + b1.size * b1.dtype.itemsize + b2.size * b2.dtype.itemsize)
    est = (2 * TM * H * x.dtype.itemsize
           + (1 if single_buf else 2) * weight_bytes
           + 2 * TM * Cp * jnp.dtype(out_dtype).itemsize
           + 4 * TM * max(H, Cp) * 4)
    if vmem_limit_bytes is None:
        # v5e scoped default is only 16 MiB; clamp to v7x physical 64 MiB/TC.
        vmem_limit_bytes = int(min(64 << 20, max(32 << 20, 2 * est)))

    cost = pl.CostEstimate(
        flops=2 * Bp * H * H + 2 * Bp * H * Cp,
        transcendentals=0,
        bytes_accessed=(x.size * x.dtype.itemsize + weight_bytes
                        + Bp * Cp * jnp.dtype(out_dtype).itemsize),
    )

    out = pl.pallas_call(
        _head_kernel,
        out_shape=jax.ShapeDtypeStruct((Bp, Cp), out_dtype),
        grid=grid,
        in_specs=[
            pl.BlockSpec((TM, H), lambda i: (i, 0)),   # activations: batch-tiled
            _resident_spec((H, H), single_buf),        # W1^T resident in VMEM
            _resident_spec((1, H), single_buf),        # b1 resident
            _resident_spec((H, Cp), single_buf),       # W2^T (padded) resident
            _resident_spec((1, Cp), single_buf),       # b2 (padded) resident
        ],
        out_specs=pl.BlockSpec((TM, Cp), lambda i: (i, 0)),
        compiler_params=pltpu.CompilerParams(
            dimension_semantics=("parallel",),          # megacore-shard the batch
            vmem_limit_bytes=vmem_limit_bytes,
        ),
        cost_estimate=cost,
    )(x, w1t, b1, w2t, b2)

    return out[:B, :C]


def distilbert_classification_head(features, w1, b1, w2, b2, *,
                                   weights_dtype=jnp.bfloat16, block_m=512,
                                   force_pallas=False):
    """Convenience wrapper matching the PyTorch module signature.  In
    production, call prepare_head_params() once at load time and reuse the
    result with apply_head(); this wrapper re-prepares weights every call."""
    params = prepare_head_params(w1, b1, w2, b2, weights_dtype=weights_dtype)
    return apply_head(features, params, block_m=block_m,
                      force_pallas=force_pallas)


def _init_linear(key, out_features, in_features):
    """Deterministic PyTorch-style default init for nn.Linear."""
    k_w, k_b = jax.random.split(key)
    bound = 1.0 / math.sqrt(in_features)
    w = jax.random.uniform(
        k_w, (out_features, in_features), jnp.float32, -bound, bound)
    b = jax.random.uniform(k_b, (out_features,), jnp.float32, -bound, bound)
    return w, b


if __name__ == "__main__":
    # Small, module-consistent shapes: batch=8, hidden=32, n_classes=4.
    B, H, C = 8, 32, 4

    key = jax.random.PRNGKey(0)
    k_feat, k_dense, k_proj = jax.random.split(key, 3)

    features = jax.random.normal(k_feat, (B, H), jnp.float32)
    w1, b1 = _init_linear(k_dense, H, H)   # self.dense:    Linear(H, H)
    w2, b2 = _init_linear(k_proj, C, H)    # self.out_proj: Linear(H, C)

    # Pure-JAX reference (PyTorch semantics: relu(x @ W1^T + b1) @ W2^T + b2).
    ref = jnp.maximum(features @ w1.T + b1, 0.0) @ w2.T + b2

    # f32-weight Pallas path (tight tolerance).
    params_f32 = prepare_head_params(w1, b1, w2, b2, weights_dtype=jnp.float32)
    out_f32 = jax.block_until_ready(
        apply_head(features, params_f32, force_pallas=True))
    assert out_f32.shape == (B, C)
    assert jnp.allclose(out_f32, ref, atol=1e-4, rtol=1e-4), "f32 path mismatch"

    # Default bf16-weight Pallas path (halved weight HBM/VMEM; looser tol
    # since both the weights and the intermediate h are quantized to bf16).
    params_bf16 = prepare_head_params(w1, b1, w2, b2)   # one-time prep
    out_bf16 = jax.block_until_ready(
        apply_head(features, params_bf16, force_pallas=True))
    assert out_bf16.shape == (B, C)
    assert jnp.allclose(out_bf16, ref, atol=1e-1, rtol=1e-1), "bf16 path mismatch"

    # Tiny-shape XLA fast path through the convenience wrapper (no kernel).
    out_fast = jax.block_until_ready(
        distilbert_classification_head(features, w1, b1, w2, b2,
                                       weights_dtype=jnp.float32))
    assert jnp.allclose(out_fast, ref, atol=1e-4, rtol=1e-4), "fast path mismatch"

    print("KERNEL_OK")
</pallas_src>

<mosaic_0001>
module attributes {stable_mosaic.version = 11 : i64} {
  func.func @_probe(%arg0: i32, %arg1: memref<8x128xf32, #tpu.memory_space<vmem>>, %arg2: memref<8x128xf32, #tpu.memory_space<vmem>>) attributes {dimension_semantics = [#tpu.dimension_semantics<arbitrary>], iteration_bounds = array<i64: 2>, scalar_prefetch = 0 : i64, scratch_operands = 0 : i64, tpu.core_type = #tpu.core_type<tc>, window_params = [{pipeline_mode = #tpu.pipeline_mode<synchronous>, transform_indices = @transform_0, window_bounds = array<i64: 8, 128>}, {pipeline_mode = #tpu.pipeline_mode<synchronous>, transform_indices = @transform_1, window_bounds = array<i64: 8, 128>}]} {
    %c0 = arith.constant 0 : index
    %c0_0 = arith.constant 0 : index
    %0 = vector.load %arg1[%c0, %c0_0] : memref<8x128xf32, #tpu.memory_space<vmem>>, vector<8x128xf32>
    %c0_1 = arith.constant 0 : index
    %c0_2 = arith.constant 0 : index
    %1 = vector.load %arg2[%c0_1, %c0_2] : memref<8x128xf32, #tpu.memory_space<vmem>>, vector<8x128xf32>
    tpu.vector_store %arg2[%c0_1, %c0_2], %0 {strides = array<i32>} : memref<8x128xf32, #tpu.memory_space<vmem>>, vector<8x128xf32>,
    return
  }
  func.func @transform_0(%arg0: i32) -> (i32, i32) {
    %c0_i32 = arith.constant 0 : i32
    %c0_i32_0 = arith.constant 0 : i32
    %c0_i32_1 = arith.constant 0 : i32
    return %c0_i32, %c0_i32_0 : i32, i32
  }
  func.func @transform_1(%arg0: i32) -> (i32, i32) {
    %c0_i32 = arith.constant 0 : i32
    %c0_i32_0 = arith.constant 0 : i32
    %c0_i32_1 = arith.constant 0 : i32
    return %c0_i32, %c0_i32_0 : i32, i32
  }
}

module attributes {stable_mosaic.version = 11 : i64} {
  func.func @_head_kernel(%arg0: i32, %arg1: memref<8x32xf32, #tpu.memory_space<vmem>>, %arg2: memref<32x32xf32, #tpu.memory_space<vmem>>, %arg3: memref<1x32xf32, #tpu.memory_space<vmem>>, %arg4: memref<32x128xf32, #tpu.memory_space<vmem>>, %arg5: memref<1x128xf32, #tpu.memory_space<vmem>>, %arg6: memref<8x128xf32, #tpu.memory_space<vmem>>) attributes {dimension_semantics = [#tpu.dimension_semantics<parallel>], iteration_bounds = array<i64: 1>, scalar_prefetch = 0 : i64, scratch_operands = 0 : i64, tpu.core_type = #tpu.core_type<tc>, window_params = [{transform_indices = @transform_0, window_bounds = array<i64: 8, 32>}, {pipeline_mode = #tpu.pipeline_mode<synchronous>, transform_indices = @transform_1, window_bounds = array<i64: 32, 32>}, {pipeline_mode = #tpu.pipeline_mode<synchronous>, transform_indices = @transform_2, window_bounds = array<i64: 1, 32>}, {pipeline_mode = #tpu.pipeline_mode<synchronous>, transform_indices = @transform_3, window_bounds = array<i64: 32, 128>}, {pipeline_mode = #tpu.pipeline_mode<synchronous>, transform_indices = @transform_4, window_bounds = array<i64: 1, 128>}, {transform_indices = @transform_5, window_bounds = array<i64: 8, 128>}]} {
    %c0 = arith.constant 0 : index
    %c0_0 = arith.constant 0 : index
    %0 = vector.load %arg1[%c0, %c0_0] : memref<8x32xf32, #tpu.memory_space<vmem>>, vector<8x32xf32>
    %c0_1 = arith.constant 0 : index
    %c0_2 = arith.constant 0 : index
    %1 = vector.load %arg2[%c0_1, %c0_2] : memref<32x32xf32, #tpu.memory_space<vmem>>, vector<32x32xf32>
    %cst = arith.constant dense<0.000000e+00> : vector<8x32xf32>
    %2 = tpu.matmul %0, %1, %cst {dimension_numbers = #tpu.dot_dimension_numbers<[1], [0], [0], [1], [0, 0, 1, 1], [], []>} : vector<8x32xf32>, vector<32x32xf32>, vector<8x32xf32> -> vector<8x32xf32>
    %c0_3 = arith.constant 0 : index
    %c0_4 = arith.constant 0 : index
    %3 = vector.load %arg3[%c0_3, %c0_4] : memref<1x32xf32, #tpu.memory_space<vmem>>, vector<1x32xf32>
    %4 = vector.broadcast %3 : vector<1x32xf32> to vector<8x32xf32>
    %5 = arith.addf %2, %4 : vector<8x32xf32>
    %cst_5 = arith.constant 0.000000e+00 : f32
    %6 = vector.broadcast %cst_5 : f32 to vector<8x32xf32>
    %7 = arith.maximumf %5, %6 : vector<8x32xf32>
    %c0_6 = arith.constant 0 : index
    %c0_7 = arith.constant 0 : index
    %8 = vector.load %arg4[%c0_6, %c0_7] : memref<32x128xf32, #tpu.memory_space<vmem>>, vector<32x128xf32>
    %cst_8 = arith.constant dense<0.000000e+00> : vector<8x128xf32>
    %9 = tpu.matmul %7, %8, %cst_8 {dimension_numbers = #tpu.dot_dimension_numbers<[1], [0], [0], [1], [0, 0, 1, 1], [], []>} : vector<8x32xf32>, vector<32x128xf32>, vector<8x128xf32> -> vector<8x128xf32>
    %c0_9 = arith.constant 0 : index
    %c0_10 = arith.constant 0 : index
    %10 = vector.load %arg5[%c0_9, %c0_10] : memref<1x128xf32, #tpu.memory_space<vmem>>, vector<1x128xf32>
    %11 = vector.broadcast %10 : vector<1x128xf32> to vector<8x128xf32>
    %12 = arith.addf %9, %11 : vector<8x128xf32>
    %c0_11 = arith.constant 0 : index
    %c0_12 = arith.constant 0 : index
    %13 = vector.load %arg6[%c0_11, %c0_12] : memref<8x128xf32, #tpu.memory_space<vmem>>, vector<8x128xf32>
    tpu.vector_store %arg6[%c0_11, %c0_12], %12 {strides = array<i32>} : memref<8x128xf32, #tpu.memory_space<vmem>>, vector<8x128xf32>,
    return
  }
  func.func @transform_0(%arg0: i32) -> (i32, i32) {
    %c0_i32 = arith.constant 0 : i32
    %c0_i32_0 = arith.constant 0 : i32
    return %arg0, %c0_i32 : i32, i32
  }
  func.func @transform_1(%arg0: i32) -> (i32, i32) {
    %c0_i32 = arith.constant 0 : i32
    %c0_i32_0 = arith.constant 0 : i32
    %c0_i32_1 = arith.constant 0 : i32
    return %c0_i32, %c0_i32_0 : i32, i32
  }
  func.func @transform_2(%arg0: i32) -> (i32, i32) {
    %c0_i32 = arith.constant 0 : i32
    %c0_i32_0 = arith.constant 0 : i32
    %c0_i32_1 = arith.constant 0 : i32
    return %c0_i32, %c0_i32_0 : i32, i32
  }
  func.func @transform_3(%arg0: i32) -> (i32, i32) {
    %c0_i32 = arith.constant 0 : i32
    %c0_i32_0 = arith.constant 0 : i32
    %c0_i32_1 = arith.constant 0 : i32
    return %c0_i32, %c0_i32_0 : i32, i32
  }
  func.func @transform_4(%arg0: i32) -> (i32, i32) {
    %c0_i32 = arith.constant 0 : i32
    %c0_i32_0 = arith.constant 0 : i32
    %c0_i32_1 = arith.constant 0 : i32
    return %c0_i32, %c0_i32_0 : i32, i32
  }
  func.func @transform_5(%arg0: i32) -> (i32, i32) {
    %c0_i32 = arith.constant 0 : i32
    %c0_i32_0 = arith.constant 0 : i32
    return %arg0, %c0_i32 : i32, i32
  }
}

</mosaic_0001>

<bundles_post_ra>
// kernel: tpu_custom_call.1
= control target key start
LH: loop header
LB: loop body
LE: loop exit
PB: predicated region body
PF: predicated region fallthrough
CT: control target
= control target key end

     0   :  { %6 = vsyncpa [#allocation3], 0  ;;  %s340_s0 = inlined_call_operand.hbm [shape: f32[8,128], index: 0, kind: input, shape index: {}]   ;;  %s341_s1 = inlined_call_operand.hbm [shape: f32[8,128], index: 1, kind: output, shape index: {}]  }
   0x1   :  { %7 = vsyncpa [#allocation4], 0  ;;  %s261_s6 = smov 0  }
   0x2 LB: > { %s144_s7 = sadd.s32 4294967295, %s247_s6   ;;  %p145_p0 = scmp.ge.s32.totalorder %s247_s6, 1  ;;  %s247_s6 = sphi %s261_s6, %s13_s6  }
   0x3   : > { %p60_p1 = scmp.lt.s32.totalorder %s247_s6, 3  ;;  %p275_p3 = scmp.eq.s32.totalorder %s144_s7, 0 }
   0x4   : > { %s249_s10 = smov [#allocation2]   ;;  %s179_s15 = scalar_lea.hbm %s340_s0, 128 }
   0x5   : > { %p269_p2 = pnand %p145_p0, %p60_p1  ;;  %s73_s11 = sshll.u32 %s249_s10, 4  ;;  %s74_s11 = int_to_ptr.vmem [resolvable:$true] %s73_s11 }
   0x6   : > { %s346_s9 = scalar_select %p275_p3, 1, 0 }
   0x7   : > { %s345_s8 = scalar_select %p269_p2, 1, 0 }
   0x8   : > { %p161_p4 = pneg %p269_p2  ;;  %p180_p6 = scmp.ne.s32.totalorder %s340_s0, %s179_s15 }
   0x9   : > { %p186_p10 = scmp.lt.u32.totalorder %s179_s15, %s340_s0 }
   0xa   : > { %p283_p5 = pnand %p275_p3, %p161_p4 }
   0xc   : > { %p181_p7 = pneg %p283_p5 }
   0xe   : > { %p182_p8 = pnand %p181_p7, %p180_p6 }
  0x10   : > { %p183_p9 = pneg %p182_p8 }
  0x12   : > { %p188_p11 = pnand %p186_p10, %p183_p9 }
  0x14   : > { %191 = shalt.err (!%p188_p11)
}
  0x15   : > { %s192_s20 = scalar_lea.vmem %s74_s11, 128  ;;  %p200_p1 = scmp.lt.s32.totalorder %s74_s11, %s74_s11 }
  0x16   : > { %p193_p12 = scmp.ne.s32.totalorder %s74_s11, %s192_s20  ;;  %p201_p4 = scmp.lt.s32.totalorder %s192_s20, %s192_s20 }
  0x18   : > { %p195_p13 = pnand %p193_p12, %p181_p7  ;;  %p202_p3 = por %p201_p4, %p200_p1 }
  0x1a   : > { %p196_p0 = pneg %p195_p13 }
  0x1c   : > { %p203_p2 = pnand %p202_p3, %p196_p0 }
  0x1e   : > { %206 = shalt.err (!%p203_p2)
}
  0x1f   : > { %164 = dma.hbm_to_vmem [thread:$0]  (!%p283_p5), %s340_s0, 128, %s74_s11, [#allocation3]  }
  0x20   : > { %p348_p6 = scmp.ne.s32.totalorder %s345_s8, 0 }
  0x21   : > { %p349_p8 = scmp.ne.s32.totalorder (!%p348_p6), %s346_s9, 0 }
  0x22   : > { %86 = sbr.rel (%p348_p6) target bundleno = 67 (0x43), region = 24 }
  0x29   : > { %238 = dma.done.wait (%p349_p8), [#allocation3], 128  }
  0x2a   : > { %240 = vsyncadd (%p349_p8), [#allocation3], 4294967168  ;;  %s250_s23 = smov [#allocation5]   ;;  %p311_p2 = scmp.eq.s32.totalorder %s144_s7, 1  ;;  %v96_v0 = vld [vmem:[#allocation2] sm:$0xff] }
  0x2b   : > { %s105_s24 = sshll.u32 %s250_s23, 4  ;;  %97 = vst [vmem:[#allocation5] sm:$0xff] %v96_v0  ;;  %s106_s24 = int_to_ptr.vmem [resolvable:$true] %s105_s24 }
  0x2c   : > { %s207_s26 = scalar_lea.vmem %s106_s24, 128  ;;  %p214_p9 = scmp.lt.s32.totalorder %s106_s24, %s106_s24 }
  0x2d   : > { %p208_p3 = scmp.ne.s32.totalorder %s106_s24, %s207_s26  ;;  %p215_p10 = scmp.lt.s32.totalorder %s207_s26, %s207_s26 }
  0x2f   : > { %p209_p5 = pnand %p208_p3, %p311_p2  ;;  %p216_p11 = por %p215_p10, %p214_p9 }
  0x31   : > { %p210_p7 = pneg %p209_p5 }
  0x33   : > { %p217_p12 = pnand %p216_p11, %p210_p7 }
  0x35   : > { %220 = shalt.err (!%p217_p12)
}
  0x36   : > { %s221_s29 = scalar_lea.hbm %s341_s1, 128 }
  0x37   : > { %p222_p13 = scmp.ne.s32.totalorder %s341_s1, %s221_s29  ;;  %p227_p4 = scmp.lt.u32.totalorder %s221_s29, %s341_s1 }
  0x39   : > { %p223_p0 = pnand %p222_p13, %p311_p2 }
  0x3b   : > { %p224_p1 = pneg %p223_p0 }
  0x3d   : > { %p229_p6 = pnand %p227_p4, %p224_p1 }
  0x3f   : > { %232 = shalt.err (!%p229_p6)
}
  0x40   : > { %158 = dma.vmem_to_hbm [thread:$0]  (%p311_p2), %s106_s24, 128, %s341_s1, [#allocation4]  }
  0x41   : > { %242 = dma.done.wait (%p311_p2), [#allocation4], 128  }
  0x42   : > { %244 = vsyncadd (%p311_p2), [#allocation4], 4294967168 }
  0x43 PF: > { %s13_s6 = sadd.s32 1, %s247_s6  }
  0x44   : > { %p10_p8 = scmp.ge.s32.totalorder %s13_s6, 4  }
  0x46   :  { %12 = sbr.rel (!%p10_p8) target bundleno = 2 (0x2), region = 53 }
  0x4d   :  { %118 = vsyncpa [#allocation3], 1 }
  0x4e   :  { %120 = vsyncpa [#allocation3 + $0x1], 1 }
  0x4f   :  { %121 = vsyncpa [#allocation4], 1 }
  0x50   :  { %123 = vsyncpa [#allocation4 + $0x1], 1 }

// kernel: tpu_custom_call.1
= control target key start
LH: loop header
LB: loop body
LE: loop exit
PB: predicated region body
PF: predicated region fallthrough
CT: control target
= control target key end

     0   :  { %10 = vsyncpa [#allocation3], 0  ;;  %s498_s0 = inlined_call_operand.hbm [shape: f32[8,32], index: 0, kind: input, shape index: {}]   ;;  %s499_s1 = inlined_call_operand.hbm [shape: f32[32,32], index: 1, kind: input, shape index: {}]   ;;  %s500_s2 = inlined_call_operand.vmem [shape: f32[1,32], index: 2, kind: input, shape index: {}]   ;;  %s501_s3 = inlined_call_operand.hbm [shape: f32[32,128], index: 3, kind: input, shape index: {}]   ;;  %s502_s4 = inlined_call_operand.vmem [shape: f32[1,128], index: 4, kind: input, shape index: {}]   ;;  %s503_s5 = inlined_call_operand.hbm [shape: f32[8,128], index: 5, kind: output, shape index: {}]  }
   0x1   :  { %11 = vsyncpa [#allocation6], 0 }
   0x2   :  { %12 = vsyncpa [#allocation4], 0  ;;  %s399_s18 = smov [#allocation5]   ;;  %s305_s22 = scalar_lea.hbm %s499_s1, 512 }
   0x3   :  { %s28_s19 = sshll.u32 %s399_s18, 4  ;;  %p306_p0 = scmp.ne.s32.totalorder %s499_s1, %s305_s22  ;;  %s29_s19 = int_to_ptr.vmem [resolvable:$true] %s28_s19 }
   0x4   :  { %p309_p1 = scmp.lt.u32.totalorder %s305_s22, %s499_s1 }
   0x6   :  { %p311_p2 = pnand %p309_p1, %p306_p0 }
   0x8   :  { %314 = shalt.err (!%p311_p2)
}
   0x9   :  { %s315_s27 = scalar_lea.vmem %s29_s19, 512  ;;  %p320_p4 = scmp.lt.s32.totalorder %s29_s19, %s29_s19 }
   0xa   :  { %p316_p3 = scmp.ne.s32.totalorder %s29_s19, %s315_s27  ;;  %p321_p5 = scmp.lt.s32.totalorder %s315_s27, %s315_s27 }
   0xc   :  { %p322_p6 = por %p321_p5, %p320_p4 }
   0xe   :  { %p323_p7 = pnand %p322_p6, %p316_p3 }
  0x10   :  { %326 = shalt.err (!%p323_p7)
}
  0x11   :  { %s400_s28 = smov 128   ;;  %s401_s29 = smov 8  }
  0x12   :  { %34 = dma.hbm_to_vmem [thread:$0]  %s499_s1, 512, %s29_s19, [#allocation6], %s400_s28, %s400_s28, %s401_s29  }
  0x13   :  { %s402_s7 = smov [#allocation2]   ;;  %s403_s9 = smov [#allocation7]  }
  0x14   :  { %s19_s8 = sshll.u32 %s402_s7, 4  ;;  %s42_s10 = sshll.u32 %s403_s9, 4  ;;  %s20_s8 = int_to_ptr.vmem [resolvable:$true] %s19_s8  ;;  %s43_s10 = int_to_ptr.vmem [resolvable:$true] %s42_s10 }
  0x15   :  { %s327_s13 = scalar_lea.hbm %s498_s0, 128 }
  0x16   :  { %p328_p8 = scmp.ne.s32.totalorder %s498_s0, %s327_s13  ;;  %p331_p9 = scmp.lt.u32.totalorder %s327_s13, %s498_s0 }
  0x18   :  { %p333_p10 = pnand %p331_p9, %p328_p8 }
  0x1a   :  { %336 = shalt.err (!%p333_p10)
}
  0x1b   :  { %s337_s1 = scalar_lea.vmem %s20_s8, 128  ;;  %p342_p12 = scmp.lt.s32.totalorder %s20_s8, %s20_s8 }
  0x1c   :  { %p338_p11 = scmp.ne.s32.totalorder %s20_s8, %s337_s1  ;;  %p343_p13 = scmp.lt.s32.totalorder %s337_s1, %s337_s1 }
  0x1e   :  { %p344_p0 = por %p343_p13, %p342_p12 }
  0x20   :  { %p345_p1 = pnand %p344_p0, %p338_p11 }
  0x22   :  { %348 = shalt.err (!%p345_p1)
}
  0x23   :  { %22 = dma.hbm_to_vmem [thread:$0]  %s498_s0, 128, %s20_s8, [#allocation3]  }
  0x24   :  { %s349_s22 = scalar_lea.hbm %s501_s3, 512 }
  0x25   :  { %p350_p2 = scmp.ne.s32.totalorder %s501_s3, %s349_s22  ;;  %p353_p3 = scmp.lt.u32.totalorder %s349_s22, %s501_s3 }
  0x27   :  { %p355_p4 = pnand %p353_p3, %p350_p2 }
  0x29   :  { %358 = shalt.err (!%p355_p4)
}
  0x2a   :  { %s359_s27 = scalar_lea.vmem %s43_s10, 512  ;;  %p364_p6 = scmp.lt.s32.totalorder %s43_s10, %s43_s10 }
  0x2b   :  { %p360_p5 = scmp.ne.s32.totalorder %s43_s10, %s359_s27  ;;  %p365_p7 = scmp.lt.s32.totalorder %s359_s27, %s359_s27 }
  0x2d   :  { %p366_p8 = por %p365_p7, %p364_p6 }
  0x2f   :  { %p367_p9 = pnand %p366_p8, %p360_p5 }
  0x31   :  { %370 = shalt.err (!%p367_p9)
}
  0x32   :  { %48 = dma.hbm_to_vmem [thread:$0]  %s501_s3, 512, %s43_s10, [#allocation6], %s400_s28, %s400_s28, %s401_s29  }
  0x33   :  { %393 = dma.done.wait [#allocation3], 128  }
  0x34   :  { %394 = vsyncadd [#allocation3], 4294967168 }
  0x35   :  { %395 = dma.done.wait [#allocation6], 1024  }
  0x36   :  { %396 = vsyncadd [#allocation6], 4294966272  ;;  %v404_v0 = vmov 0.0|0.0   ;;  %vm405_vm0 = vmmov 0   ;;  %v406_v1 = vmov 0.0   ;;  %v61_v2 = vld [vmem:[#allocation5] sm:$0xff] }
  0x37   :  { %284 = vmatprep.subr.bf16.mxu0 %v404_v0  ;;  %270 = vmatprep.mubr.msk.f32.mxu0 %vm405_vm0, %v406_v1  ;;  %v62_v3 = vld [vmem:[#allocation5 + $0x8] sm:$0xff]  ;;  %v63_v4 = vld [vmem:[#allocation5 + $0x10] sm:$0xff]  ;;  %v64_v6 = vld [vmem:[#allocation5 + $0x18] sm:$0xff]  ;;  %vm72_vm1 = vcmask 261120   ;;  %s407_s7 = smov [#allocation8]  }
  0x38   :  { %290 = vmatprep.subr.bf16.mxu1 %v404_v0  ;;  %281 = vmatprep.mubr.msk.f32.mxu1 %vm405_vm0, %v406_v1  ;;  %v285_v5 = vpack.c.bf16 %v62_v3, %v61_v2  ;;  %v147_v7 = vld [vmem:[#allocation7] sm:$0xff]  ;;  %v148_v8 = vld [vmem:[#allocation7 + $0x8] sm:$0xff]  ;;  %v288_v9 = vpack.c.bf16 %v64_v6, %v63_v4  ;;  %v60_v11 = vld [vmem:[#allocation2] sm:$0xff]  ;;  %s238_s8 = sshll.u32 %s407_s7, 4  ;;  %s239_s8 = int_to_ptr.vmem [resolvable:$true] %s238_s8 }
  0x39   :  { %v291_v10 = vpack.c.bf16 %v148_v8, %v147_v7  ;;  %v149_v12 = vld [vmem:[#allocation7 + $0x10] sm:$0xff]  ;;  %v150_v13 = vld [vmem:[#allocation7 + $0x18] sm:$0xff]  ;;  %s371_s9 = scalar_lea.vmem %s239_s8, 128  ;;  %p376_p11 = scmp.lt.s32.totalorder %s239_s8, %s239_s8 }
  0x3a   :  { %286 = vmatpush3.bf16.msra.mxu0 %v285_v5  ;;  %v294_v14 = vpack.c.bf16 %v150_v13, %v149_v12  ;;  %v248_v15 = vld [vmem:[%s500_s2] ss:$0 sm:$0xff]  ;;  %p372_p10 = scmp.ne.s32.totalorder %s239_s8, %s371_s9  ;;  %p377_p12 = scmp.lt.s32.totalorder %s371_s9, %s371_s9 }
  0x3b   :  { %287 = vmatprep.subr.bf16.mxu0 %v404_v0  ;;  %292 = vmatpush3.bf16.msra.mxu1 %v291_v10  ;;  %v250_v20 = vld [vmem:[%s502_s4] ss:$0 sm:$0xff] }
  0x3c   :  { %293 = vmatprep.subr.bf16.mxu1 %v404_v0  ;;  %p378_p13 = por %p377_p12, %p376_p11 }
  0x3e   :  { %289 = vmatpush3.bf16.msra.mxu0 %v288_v9  ;;  %p379_p0 = pnand %p378_p13, %p372_p10 }
  0x3f   :  { %295 = vmatpush3.bf16.msra.mxu1 %v294_v14 }
  0x41   :  { %271 = vmatmul.mubr.msk.f32.vlgmr.msra.gmra.mrb[0].mxu0 %vm72_vm1, %v60_v11 }
 0x114   :  { %v142_v16 = vpop.f32.mrb[0].mxu0 }
 0x115   :  { %v143_v17 = vadd.f32 %v248_v15, %v142_v16  ;;  %v272_v18 = vpop.f32.mrb[1].mxu0 }
 0x117   :  { %v146_v19 = vmax.f32 %v143_v17, 0.0 }
 0x119   :  { %282 = vmatmul.mubr.msk.f32.vlgmr.msra.gmra.mrb[0].mxu1 %vm72_vm1, %v146_v19 }
 0x1ec   :  { %v227_v21 = vpop.f32.mrb[0].mxu1 }
 0x1ed   :  { %v228_v22 = vadd.f32 %v250_v20, %v227_v21  ;;  %v283_v23 = vpop.f32.mrb[1].mxu1 }
 0x1ef   :  { %231 = vst [vmem:[#allocation8] sm:$0xff] %v228_v22 }
 0x1f0   :  { %382 = shalt.err (!%p379_p0)
}
 0x1f1   :  { %s383_s11 = scalar_lea.hbm %s503_s5, 128 }
 0x1f2   :  { %p384_p1 = scmp.ne.s32.totalorder %s503_s5, %s383_s11  ;;  %p387_p2 = scmp.lt.u32.totalorder %s383_s11, %s503_s5 }
 0x1f4   :  { %p389_p3 = pnand %p387_p2, %p384_p1 }
 0x1f6   :  { %392 = shalt.err (!%p389_p3)
}
 0x1f7   :  { %241 = dma.vmem_to_hbm [thread:$0]  %s239_s8, 128, %s503_s5, [#allocation4]  }
 0x1f8   :  { %397 = dma.done.wait [#allocation4], 128  }
 0x1f9   :  { %398 = vsyncadd [#allocation4], 4294967168 }
 0x1fa   :  { %245 = vsyncpa [#allocation3], 1 }
 0x1fb   :  { %246 = vsyncpa [#allocation6], 1 }
 0x1fc   :  { %247 = vsyncpa [#allocation4], 1 }

</bundles_post_ra>
